<compile_context>
chip_gen: v6e
topology: v6e:2x2x1
jax: 0.10.0
libtpu: 0.0.40
codegen_flags: <defaults>
</compile_context>

<pallas_src>
import jax
import jax.numpy as jnp
from jax import lax
from jax.experimental import pallas as pl
from jax.experimental.pallas import tpu as pltpu

# ---- small, module-consistent config ----
BATCH = 2
SEQ = 8
HIDDEN_SIZE = 32       # config.hidden_size
EMBEDDING_SIZE = 32    # config.embedding_size
VOCAB_SIZE = 256       # config.vocab_size (multiple of 128 -> lane-dense output)
LN_EPS = 1e-5          # nn.LayerNorm default

_INV_SQRT2 = 0.7071067811865476  # hoisted 1/sqrt(2) constant


def mlm_head_kernel(x_ref, wd_ref, bd_ref, gamma_ref, beta_ref,
                    wdec_ref, bdec_ref, o_ref, hn_ref):
    """Grid = (M // TM, V // TN); j (vocab) is the inner, 'arbitrary' axis."""
    j = pl.program_id(1)

    # dense -> gelu -> LayerNorm: compute once per row tile, keep in VMEM scratch.
    @pl.when(j == 0)
    def _():
        # MXU in the operands' native dtype, f32 accumulation.
        h = jnp.dot(x_ref[...], wd_ref[...],
                    preferred_element_type=jnp.float32)
        h = h + bd_ref[...].astype(jnp.float32)

        # exact erf-based gelu (matches ACT2FN["gelu"])
        h = 0.5 * h * (1.0 + lax.erf(h * _INV_SQRT2))

        # LayerNorm over embedding axis (biased variance), f32 math on the VPU.
        mean = jnp.mean(h, axis=-1, keepdims=True)
        centered = h - mean
        var = jnp.mean(centered * centered, axis=-1, keepdims=True)
        hn = centered * lax.rsqrt(var + LN_EPS)
        hn = hn * gamma_ref[...].astype(jnp.float32) \
               + beta_ref[...].astype(jnp.float32)
        hn_ref[...] = hn

    # decoder: (TM, E) @ (E, TN) + (1, TN) for the current vocab tile.
    # Cast the cached activations to the weight dtype so the MXU runs at the
    # bf16 rate when bf16 params are supplied (no-op for f32).
    hn = hn_ref[...].astype(wdec_ref.dtype)
    out = jnp.dot(hn, wdec_ref[...], preferred_element_type=jnp.float32)
    out = out + bdec_ref[...].astype(jnp.float32)
    o_ref[...] = out.astype(o_ref.dtype)


def _nbytes(shape, dtype):
    n = 1
    for d in shape:
        n *= int(d)
    return n * jnp.dtype(dtype).itemsize


def albert_mlm_head(hidden_states, w_dense, b_dense, ln_gamma, ln_beta,
                    w_decoder, b_decoder, *, out_dtype=jnp.float32,
                    tm=None, tn=None):
    """hidden_states: (B, S, H). Linear weights passed pre-transposed as (in, out).

    Returns prediction scores (B, S, V) in `out_dtype`.
    """
    B, S, H = hidden_states.shape
    E = w_dense.shape[1]
    V = w_decoder.shape[1]
    M = B * S

    # Row tile: fill the MXU rows (256 on v6e/v7x, 128 on v5e) when M allows;
    # otherwise take all rows in a single tile (toy case: TM = M = 16).
    if tm is None:
        for cand in (256, 128):
            if M % cand == 0:
                tm = cand
                break
        else:
            tm = M
    # Vocab tile: lane-dense multiple of 128 (real ALBERT vocab should be padded
    # to a multiple of 128, e.g. 30522 -> 30592, with padded logits masked).
    if tn is None:
        for cand in (2048, 1024, 512, 256, 128):
            if V % cand == 0:
                tn = cand
                break
        else:
            tn = V
    assert M % tm == 0 and V % tn == 0
    assert (tn % 128 == 0) or (tn == V), "vocab tile should be lane-dense"

    x2d = hidden_states.reshape(M, H)
    bd2 = b_dense.reshape(1, E)
    g2 = ln_gamma.reshape(1, E)
    bt2 = ln_beta.reshape(1, E)
    bdec2 = b_decoder.reshape(1, V)

    grid = (M // tm, V // tn)

    # Explicit scoped-VMEM budget: 2x (double-buffer) for every streamed block
    # plus the f32 activation scratch, floored at 32 MiB, capped for v7x.
    est = 2 * (_nbytes((tm, H), x2d.dtype)
               + _nbytes((H, E), w_dense.dtype)
               + 3 * _nbytes((1, E), jnp.float32)
               + _nbytes((E, tn), w_decoder.dtype)
               + _nbytes((1, tn), bdec2.dtype)
               + _nbytes((tm, tn), out_dtype)) \
          + _nbytes((tm, E), jnp.float32)
    vmem_limit = min(max(est + (8 << 20), 32 << 20), 64 << 20)

    out = pl.pallas_call(
        mlm_head_kernel,
        out_shape=jax.ShapeDtypeStruct((M, V), out_dtype),
        grid=grid,
        in_specs=[
            pl.BlockSpec((tm, H), lambda i, j: (i, 0)),    # x rows
            pl.BlockSpec((H, E), lambda i, j: (0, 0)),     # dense weight (in, out)
            pl.BlockSpec((1, E), lambda i, j: (0, 0)),     # dense bias
            pl.BlockSpec((1, E), lambda i, j: (0, 0)),     # LN gamma
            pl.BlockSpec((1, E), lambda i, j: (0, 0)),     # LN beta
            pl.BlockSpec((E, tn), lambda i, j: (0, j)),    # decoder weight, vocab-tiled
            pl.BlockSpec((1, tn), lambda i, j: (0, j)),    # decoder bias (tied self.bias)
        ],
        out_specs=pl.BlockSpec((tm, tn), lambda i, j: (i, j)),
        scratch_shapes=[pltpu.VMEM((tm, E), jnp.float32)],  # cached LN(gelu(dense(x)))
        compiler_params=pltpu.CompilerParams(
            dimension_semantics=("parallel", "arbitrary"),
            vmem_limit_bytes=int(vmem_limit)),
    )(x2d, w_dense, bd2, g2, bt2, w_decoder, bdec2)

    return out.reshape(B, S, V)


def reference(hidden_states, w_dense, b_dense, ln_gamma, ln_beta,
              w_decoder, b_decoder):
    x = hidden_states.astype(jnp.float32)
    h = x @ w_dense.astype(jnp.float32) + b_dense.astype(jnp.float32)
    h = 0.5 * h * (1.0 + lax.erf(h / jnp.sqrt(2.0)))
    mean = jnp.mean(h, axis=-1, keepdims=True)
    var = jnp.mean((h - mean) ** 2, axis=-1, keepdims=True)
    h = (h - mean) / jnp.sqrt(var + LN_EPS) * ln_gamma.astype(jnp.float32) \
        + ln_beta.astype(jnp.float32)
    return h @ w_decoder.astype(jnp.float32) + b_decoder.astype(jnp.float32)


if __name__ == "__main__":
    key = jax.random.PRNGKey(0)
    k_x, k_wd, k_bd, k_wdec = jax.random.split(key, 4)

    hidden_states = jax.random.normal(k_x, (BATCH, SEQ, HIDDEN_SIZE), jnp.float32)

    # nn.Linear weight is (out, in); we build (in, out) directly (pre-transposed).
    w_dense = jax.random.normal(k_wd, (HIDDEN_SIZE, EMBEDDING_SIZE), jnp.float32) * 0.02
    b_dense = jax.random.normal(k_bd, (EMBEDDING_SIZE,), jnp.float32) * 0.02
    ln_gamma = jnp.ones((EMBEDDING_SIZE,), jnp.float32)     # LayerNorm init
    ln_beta = jnp.zeros((EMBEDDING_SIZE,), jnp.float32)
    w_decoder = jax.random.normal(k_wdec, (EMBEDDING_SIZE, VOCAB_SIZE), jnp.float32) * 0.02
    b_decoder = jnp.zeros((VOCAB_SIZE,), jnp.float32)       # self.bias init: zeros

    ref = reference(hidden_states, w_dense, b_dense, ln_gamma, ln_beta,
                    w_decoder, b_decoder)

    # f32 path; tn=128 exercises the vocab-tiled 2-D grid + scratch reuse.
    scores = albert_mlm_head(hidden_states, w_dense, b_dense, ln_gamma, ln_beta,
                             w_decoder, b_decoder, out_dtype=jnp.float32, tn=128)
    jax.block_until_ready(scores)
    assert scores.shape == (BATCH, SEQ, VOCAB_SIZE)
    assert jnp.allclose(scores, ref, atol=1e-4, rtol=1e-4)

    # bf16 operands + bf16 output (full-rate MXU path on v6e/v7x, halved HBM
    # writeback); accumulation stays f32 inside the kernel.
    bf16 = jnp.bfloat16
    scores_bf16 = albert_mlm_head(
        hidden_states.astype(bf16), w_dense.astype(bf16), b_dense.astype(bf16),
        ln_gamma.astype(bf16), ln_beta.astype(bf16),
        w_decoder.astype(bf16), b_decoder.astype(bf16),
        out_dtype=bf16, tn=128)
    jax.block_until_ready(scores_bf16)
    assert scores_bf16.dtype == bf16
    assert jnp.allclose(scores_bf16.astype(jnp.float32), ref, atol=3e-2, rtol=5e-2)

    print("KERNEL_OK")
</pallas_src>

<mosaic_0001>
module attributes {stable_mosaic.version = 11 : i64} {
  func.func @mlm_head_kernel(%arg0: i32, %arg1: i32, %arg2: memref<16x32xf32, #tpu.memory_space<vmem>>, %arg3: memref<32x32xf32, #tpu.memory_space<vmem>>, %arg4: memref<1x32xf32, #tpu.memory_space<vmem>>, %arg5: memref<1x32xf32, #tpu.memory_space<vmem>>, %arg6: memref<1x32xf32, #tpu.memory_space<vmem>>, %arg7: memref<32x128xf32, #tpu.memory_space<vmem>>, %arg8: memref<1x128xf32, #tpu.memory_space<vmem>>, %arg9: memref<16x128xf32, #tpu.memory_space<vmem>>, %arg10: memref<16x32xf32, #tpu.memory_space<vmem>>) attributes {dimension_semantics = [#tpu.dimension_semantics<parallel>, #tpu.dimension_semantics<arbitrary>], iteration_bounds = array<i64: 1, 2>, scalar_prefetch = 0 : i64, scratch_operands = 1 : i64, tpu.core_type = #tpu.core_type<tc>, window_params = [{transform_indices = @transform_0, window_bounds = array<i64: 16, 32>}, {pipeline_mode = #tpu.pipeline_mode<synchronous>, transform_indices = @transform_1, window_bounds = array<i64: 32, 32>}, {pipeline_mode = #tpu.pipeline_mode<synchronous>, transform_indices = @transform_2, window_bounds = array<i64: 1, 32>}, {pipeline_mode = #tpu.pipeline_mode<synchronous>, transform_indices = @transform_3, window_bounds = array<i64: 1, 32>}, {pipeline_mode = #tpu.pipeline_mode<synchronous>, transform_indices = @transform_4, window_bounds = array<i64: 1, 32>}, {transform_indices = @transform_5, window_bounds = array<i64: 32, 128>}, {transform_indices = @transform_6, window_bounds = array<i64: 1, 128>}, {transform_indices = @transform_7, window_bounds = array<i64: 16, 128>}]} {
    %c0_i32 = arith.constant 0 : i32
    %0 = arith.cmpi eq, %arg1, %c0_i32 : i32
    %1 = arith.extui %0 : i1 to i32
    %c0_i32_0 = arith.constant 0 : i32
    %2 = arith.cmpi ne, %1, %c0_i32_0 : i32
    scf.if %2 {
      %c0_8 = arith.constant 0 : index
      %c0_9 = arith.constant 0 : index
      %10 = vector.load %arg2[%c0_8, %c0_9] : memref<16x32xf32, #tpu.memory_space<vmem>>, vector<16x32xf32>
      %c0_10 = arith.constant 0 : index
      %c0_11 = arith.constant 0 : index
      %11 = vector.load %arg3[%c0_10, %c0_11] : memref<32x32xf32, #tpu.memory_space<vmem>>, vector<32x32xf32>
      %cst_12 = arith.constant dense<0.000000e+00> : vector<16x32xf32>
      %12 = tpu.matmul %10, %11, %cst_12 {dimension_numbers = #tpu.dot_dimension_numbers<[1], [0], [0], [1], [0, 0, 1, 1], [], []>} : vector<16x32xf32>, vector<32x32xf32>, vector<16x32xf32> -> vector<16x32xf32>
      %c0_13 = arith.constant 0 : index
      %c0_14 = arith.constant 0 : index
      %13 = vector.load %arg4[%c0_13, %c0_14] : memref<1x32xf32, #tpu.memory_space<vmem>>, vector<1x32xf32>
      %14 = vector.broadcast %13 : vector<1x32xf32> to vector<16x32xf32>
      %15 = arith.addf %12, %14 : vector<16x32xf32>
      %cst_15 = arith.constant 5.000000e-01 : f32
      %16 = vector.broadcast %cst_15 : f32 to vector<16x32xf32>
      %17 = arith.mulf %16, %15 : vector<16x32xf32>
      %cst_16 = arith.constant 0.707106769 : f32
      %18 = vector.broadcast %cst_16 : f32 to vector<16x32xf32>
      %19 = arith.mulf %15, %18 : vector<16x32xf32>
      %20 = math.erf %19 : vector<16x32xf32>
      %cst_17 = arith.constant 1.000000e+00 : f32
      %21 = vector.broadcast %cst_17 : f32 to vector<16x32xf32>
      %22 = arith.addf %21, %20 : vector<16x32xf32>
      %23 = arith.mulf %17, %22 : vector<16x32xf32>
      %cst_18 = arith.constant dense<0.000000e+00> : vector<16xf32>
      %24 = vector.multi_reduction <add>, %23, %cst_18 [1] : vector<16x32xf32> to vector<16xf32>
      %25 = vector.shape_cast %24 : vector<16xf32> to vector<16x1xf32>
      %cst_19 = arith.constant 3.200000e+01 : f32
      %26 = vector.broadcast %cst_19 : f32 to vector<16x1xf32>
      %27 = arith.divf %25, %26 : vector<16x1xf32>
      %28 = vector.broadcast %27 : vector<16x1xf32> to vector<16x32xf32>
      %29 = arith.subf %23, %28 : vector<16x32xf32>
      %30 = arith.mulf %29, %29 : vector<16x32xf32>
      %cst_20 = arith.constant dense<0.000000e+00> : vector<16xf32>
      %31 = vector.multi_reduction <add>, %30, %cst_20 [1] : vector<16x32xf32> to vector<16xf32>
      %32 = vector.shape_cast %31 : vector<16xf32> to vector<16x1xf32>
      %cst_21 = arith.constant 3.200000e+01 : f32
      %33 = vector.broadcast %cst_21 : f32 to vector<16x1xf32>
      %34 = arith.divf %32, %33 : vector<16x1xf32>
      %cst_22 = arith.constant 9.99999974E-6 : f32
      %35 = vector.broadcast %cst_22 : f32 to vector<16x1xf32>
      %36 = arith.addf %34, %35 : vector<16x1xf32>
      %37 = math.rsqrt %36 : vector<16x1xf32>
      %38 = vector.broadcast %37 : vector<16x1xf32> to vector<16x32xf32>
      %39 = arith.mulf %29, %38 : vector<16x32xf32>
      %c0_23 = arith.constant 0 : index
      %c0_24 = arith.constant 0 : index
      %40 = vector.load %arg5[%c0_23, %c0_24] : memref<1x32xf32, #tpu.memory_space<vmem>>, vector<1x32xf32>
      %41 = vector.broadcast %40 : vector<1x32xf32> to vector<16x32xf32>
      %42 = arith.mulf %39, %41 : vector<16x32xf32>
      %c0_25 = arith.constant 0 : index
      %c0_26 = arith.constant 0 : index
      %43 = vector.load %arg6[%c0_25, %c0_26] : memref<1x32xf32, #tpu.memory_space<vmem>>, vector<1x32xf32>
      %44 = vector.broadcast %43 : vector<1x32xf32> to vector<16x32xf32>
      %45 = arith.addf %42, %44 : vector<16x32xf32>
      %c0_27 = arith.constant 0 : index
      %c0_28 = arith.constant 0 : index
      %46 = vector.load %arg10[%c0_27, %c0_28] : memref<16x32xf32, #tpu.memory_space<vmem>>, vector<16x32xf32>
      tpu.vector_store %arg10[%c0_27, %c0_28], %45 {strides = array<i32>} : memref<16x32xf32, #tpu.memory_space<vmem>>, vector<16x32xf32>,
    } else {
    }
    %c0 = arith.constant 0 : index
    %c0_1 = arith.constant 0 : index
    %3 = vector.load %arg10[%c0, %c0_1] : memref<16x32xf32, #tpu.memory_space<vmem>>, vector<16x32xf32>
    %c0_2 = arith.constant 0 : index
    %c0_3 = arith.constant 0 : index
    %4 = vector.load %arg7[%c0_2, %c0_3] : memref<32x128xf32, #tpu.memory_space<vmem>>, vector<32x128xf32>
    %cst = arith.constant dense<0.000000e+00> : vector<16x128xf32>
    %5 = tpu.matmul %3, %4, %cst {dimension_numbers = #tpu.dot_dimension_numbers<[1], [0], [0], [1], [0, 0, 1, 1], [], []>} : vector<16x32xf32>, vector<32x128xf32>, vector<16x128xf32> -> vector<16x128xf32>
    %c0_4 = arith.constant 0 : index
    %c0_5 = arith.constant 0 : index
    %6 = vector.load %arg8[%c0_4, %c0_5] : memref<1x128xf32, #tpu.memory_space<vmem>>, vector<1x128xf32>
    %7 = vector.broadcast %6 : vector<1x128xf32> to vector<16x128xf32>
    %8 = arith.addf %5, %7 : vector<16x128xf32>
    %c0_6 = arith.constant 0 : index
    %c0_7 = arith.constant 0 : index
    %9 = vector.load %arg9[%c0_6, %c0_7] : memref<16x128xf32, #tpu.memory_space<vmem>>, vector<16x128xf32>
    tpu.vector_store %arg9[%c0_6, %c0_7], %8 {strides = array<i32>} : memref<16x128xf32, #tpu.memory_space<vmem>>, vector<16x128xf32>,
    return
  }
  func.func @transform_0(%arg0: i32, %arg1: i32) -> (i32, i32) {
    %c0_i32 = arith.constant 0 : i32
    %c0_i32_0 = arith.constant 0 : i32
    return %arg0, %c0_i32 : i32, i32
  }
  func.func @transform_1(%arg0: i32, %arg1: i32) -> (i32, i32) {
    %c0_i32 = arith.constant 0 : i32
    %c0_i32_0 = arith.constant 0 : i32
    %c0_i32_1 = arith.constant 0 : i32
    return %c0_i32, %c0_i32_0 : i32, i32
  }
  func.func @transform_2(%arg0: i32, %arg1: i32) -> (i32, i32) {
    %c0_i32 = arith.constant 0 : i32
    %c0_i32_0 = arith.constant 0 : i32
    %c0_i32_1 = arith.constant 0 : i32
    return %c0_i32, %c0_i32_0 : i32, i32
  }
  func.func @transform_3(%arg0: i32, %arg1: i32) -> (i32, i32) {
    %c0_i32 = arith.constant 0 : i32
    %c0_i32_0 = arith.constant 0 : i32
    %c0_i32_1 = arith.constant 0 : i32
    return %c0_i32, %c0_i32_0 : i32, i32
  }
  func.func @transform_4(%arg0: i32, %arg1: i32) -> (i32, i32) {
    %c0_i32 = arith.constant 0 : i32
    %c0_i32_0 = arith.constant 0 : i32
    %c0_i32_1 = arith.constant 0 : i32
    return %c0_i32, %c0_i32_0 : i32, i32
  }
  func.func @transform_5(%arg0: i32, %arg1: i32) -> (i32, i32) {
    %c0_i32 = arith.constant 0 : i32
    %c0_i32_0 = arith.constant 0 : i32
    return %c0_i32, %arg1 : i32, i32
  }
  func.func @transform_6(%arg0: i32, %arg1: i32) -> (i32, i32) {
    %c0_i32 = arith.constant 0 : i32
    %c0_i32_0 = arith.constant 0 : i32
    return %c0_i32, %arg1 : i32, i32
  }
  func.func @transform_7(%arg0: i32, %arg1: i32) -> (i32, i32) {
    %c0_i32 = arith.constant 0 : i32
    return %arg0, %arg1 : i32, i32
  }
}

</mosaic_0001>

<bundles_post_ra>
// kernel: tpu_custom_call.1
= control target key start
LH: loop header
LB: loop body
LE: loop exit
PB: predicated region body
PF: predicated region fallthrough
CT: control target
= control target key end

     0   :  { %s1364_s0 = inlined_call_operand.hbm [shape: f32[16,32], index: 0, kind: input, shape index: {}]   ;;  %s1365_s1 = inlined_call_operand.hbm [shape: f32[32,32], index: 1, kind: input, shape index: {}]   ;;  %s1366_s2 = inlined_call_operand.vmem [shape: f32[1,32], index: 2, kind: input, shape index: {}]   ;;  %s1367_s3 = inlined_call_operand.vmem [shape: f32[1,32], index: 3, kind: input, shape index: {}]   ;;  %s1368_s4 = inlined_call_operand.vmem [shape: f32[1,32], index: 4, kind: input, shape index: {}]   ;;  %s1369_s5 = inlined_call_operand.hbm [shape: f32[32,256], index: 5, kind: input, shape index: {}]   ;;  %s1370_s6 = inlined_call_operand.vmem [shape: f32[1,256], index: 6, kind: input, shape index: {}]   ;;  %s1371_s7 = inlined_call_operand.hbm [shape: f32[16,256], index: 7, kind: output, shape index: {}]  }
   0x1   :  { %1380 = sst [smem:[#allocation17_spill]] %s1364_s0 }
   0x2   :  { %1381 = sst [smem:[#allocation18_spill]] %s1365_s1 }
   0x3   :  { %12 = vsyncpa [#allocation4], 0 }
   0x4   :  { %13 = vsyncpa [#allocation7], 0 }
   0x5   :  { %14 = vsyncpa [#allocation5], 0 }
   0x6   :  { %16 = vsyncpa [#allocation5 + $0x1], 0  ;;  %s1120_s24 = smov 0   ;;  %s1122_s25 = smov 0  }
   0x7   :  { %s1124_s26 = smov 0   ;;  %s1126_s27 = smov 0  }
   0x8   :  { %s1128_s28 = smov 0   ;;  %s1130_s29 = smov 0  }
   0x9 LB: > { %1382 = sst [smem:[#allocation14_spill]] %s1048_s24  ;;  %s1151_s30 = sadd.s32 4294967295, %s1068_s29   ;;  %s1068_s29 = sphi %s1130_s29, %s22_s29   ;;  %s1064_s28 = sphi %s1128_s28, %s1411_s28   ;;  %s1060_s27 = sphi %s1126_s27, %s1410_s27   ;;  %s1056_s26 = sphi %s1124_s26, %s1409_s26   ;;  %s1052_s25 = sphi %s1122_s25, %s1408_s25   ;;  %s1048_s24 = sphi %s1120_s24, %s1407_s24  }
   0xa   : > { %1383 = sst [smem:[#allocation15_spill]] %s1068_s29  ;;  %s744_s8 = sadd.s32 4294967294, %s1068_s29  }
   0xb   : > { %p158_p0 = scmp.ne.s32.totalorder %s1056_s26, %s1052_s25  ;;  %p159_p1 = scmp.eq.s32.totalorder %s1068_s29, 0 }
   0xc   : > { %p164_p2 = scmp.ne.s32.totalorder %s1052_s25, %s1048_s24  ;;  %p1372_p3 = scmp.eq.s32.totalorder %s1151_s30, 0 }
   0xd   : > { %p216_p4 = scmp.eq.s32.totalorder %s1151_s30, 1  ;;  %p1162_p5 = por %p159_p1, %p158_p0 }
   0xe   : > { %p222_p6 = scmp.eq.s32.totalorder %s744_s8, 1  ;;  %p1168_p7 = por %p1372_p3, %p164_p2 }
   0xf   : > { %p1172_p8 = por %p216_p4, %p158_p0  ;;  %p745_p10 = scmp.ge.s32.totalorder %s1068_s29, 1 }
  0x10   : > { %p1176_p9 = por %p222_p6, %p164_p2  ;;  %p229_p11 = scmp.lt.s32.totalorder %s1068_s29, 3 }
  0x11   : > { %s1386_s12 = scalar_select %p1172_p8, 1, 0 }
  0x12   : > { %s1387_s13 = scalar_select %p1176_p9, 1, 0 }
  0x13   : > { %p1182_p12 = pnand %p745_p10, %p229_p11  ;;  %s1070_s15 = smov [#allocation3]  }
  0x14   : > { %1388 = sst [smem:[#allocation16_spill]] %s1387_s13  ;;  %s244_s16 = sshll.u32 %s1070_s15, 4  ;;  %s245_s16 = int_to_ptr.vmem [resolvable:$true] %s244_s16 }
  0x15   : > { %p815_p13 = pneg %p1182_p12  ;;  %p832_p1 = scmp.lt.s32.totalorder %s1068_s29, 2 }
  0x16   : > { %s1071_s18 = smov [#allocation6]   ;;  %s911_s21 = scalar_lea.vmem %s245_s16, 256 }
  0x17   : > { %p1192_p4 = pnand %p815_p13, %p1372_p3  ;;  %s257_s19 = sshll.u32 %s1071_s18, 4  ;;  %s258_s19 = int_to_ptr.vmem [resolvable:$true] %s257_s19 }
  0x18   : > { %p1198_p2 = pnand %p832_p1, %p1162_p5  ;;  %p912_p10 = scmp.ne.s32.totalorder %s245_s16, %s911_s21 }
  0x19   : > { %p902_p6 = pneg %p1192_p4  ;;  %p919_p0 = scmp.lt.s32.totalorder %s245_s16, %s245_s16 }
  0x1a   : > { %p920_p3 = scmp.lt.s32.totalorder %s911_s21, %s911_s21 }
  0x1b   : > { %p914_p11 = pnand %p912_p10, %p902_p6 }
  0x1c   : > { %p921_p9 = por %p920_p3, %p919_p0 }
  0x1d   : > { %p915_p13 = pneg %p914_p11 }
  0x1f   : > { %p922_p8 = pnand %p921_p9, %p915_p13 }
  0x21   : > { %925 = shalt.err (!%p922_p8)
}
  0x22   : > { %s1376_s22 = smov 128   ;;  %s1377_s23 = smov 8  }
  0x23   : > { %s1392_s0 = sld [smem:[#allocation17_spill]]  ;;  %s937_s15 = scalar_lea.vmem %s258_s19, 512 }
  0x24   : > { %p938_p5 = scmp.ne.s32.totalorder %s258_s19, %s937_s15  ;;  %p945_p9 = scmp.lt.s32.totalorder %s258_s19, %s258_s19 }
  0x25   : > { %p946_p8 = scmp.lt.s32.totalorder %s937_s15, %s937_s15 }
  0x26   : > { %p940_p1 = pnand %p938_p5, %p902_p6 }
  0x27   : > { %p947_p0 = por %p946_p8, %p945_p9 }
  0x28   : > { %p941_p3 = pneg %p940_p1 }
  0x29   : > { %818 = dma.hbm_to_vmem [thread:$0]  (!%p1192_p4), %s1392_s0, 256, %s245_s16, [#allocation4], %s1376_s22, %s1376_s22, %s1377_s23  }
  0x2a   : > { %p948_p10 = pnand %p947_p0, %p941_p3 }
  0x2c   : > { %951 = shalt.err (!%p948_p10)
}
  0x2d   : > { %s1393_s1 = sld [smem:[#allocation18_spill]]  ;;  %s31_s16 = sadd.s32 1, %s1064_s28 }
  0x2e   : > { %s280_s8 = sand.u32 1, %s1068_s29   ;;  %p32_p6 = scmp.ge.s32.totalorder %s31_s16, 2 }
  0x2f   : > { %s282_s10 = sand.u32 1, %s1056_s26   ;;  %s750_s17 = sshll.u32 %s1064_s28, 7 }
  0x30   : > { %s1413_s16 = smov (%p32_p6, %s31_s16), 0  ;;  %s749_s15 = sshll.u32 %s282_s10, 5 }
  0x31   : > { %s289_s21 = scalar_lea.hbm %s1369_s5, %s750_s17  ;;  %s148_s0 = ssub.s32 %s1064_s28, %s1413_s16 }
  0x32   : > { %p149_p11 = scmp.eq.s32.totalorder %s148_s0, 0  ;;  %s284_s13 = scalar_lea.vmem [#allocation8], %s749_s15 }
  0x33   : > { %821 = dma.hbm_to_vmem [thread:$0]  (!%p1192_p4), %s1393_s1, 512, %s258_s19, [#allocation7], %s1376_s22, %s1376_s22, %s1377_s23  }
  0x34   : > { %s290_s24 = sshll.u32 %s284_s13, 4  ;;  %s1394_s19 = sadd.s32 1, %s1056_s26  ;;  %s291_s24 = int_to_ptr.vmem [resolvable:$true] %s290_s24 }
  0x35   : > { %s1240_s22 = scalar_select %p149_p11, %s1056_s26, %s1394_s19  }
  0x36   : > { %s281_s23 = scalar_lea.sflag [#allocation4], %s280_s8  ;;  %p954_p4 = pneg %p1198_p2 }
  0x37   : > { %s965_s1 = scalar_lea.vmem %s291_s24, 512  ;;  %s1074_s10 = smov [#allocation8]  }
  0x38   : > { %p966_p13 = scmp.ne.s32.totalorder %s291_s24, %s965_s1  ;;  %s970_s29 = sshll.u32 %s1074_s10, 4  ;;  %s971_s29 = int_to_ptr.vmem [resolvable:$false] %s970_s29 }
  0x39   : > { %s972_s9 = scalar_lea.vmem %s971_s29, 1024  ;;  %p973_p3 = scmp.lt.s32.totalorder %s291_s24, %s971_s29 }
  0x3a   : > { %p968_p5 = pnand %p966_p13, %p954_p4  ;;  %p974_p9 = scmp.lt.s32.totalorder %s972_s9, %s965_s1 }
  0x3c   : > { %p969_p1 = pneg %p968_p5  ;;  %p975_p8 = por %p974_p9, %p973_p3 }
  0x3e   : > { %p976_p0 = pnand %p975_p8, %p969_p1 }
  0x40   : > { %979 = shalt.err (!%p976_p0)
}
  0x41   : > { %s1075_s0 = smov 256   ;;  %s1395_s13 = smov 8  }
  0x42   : > { %s1396_s8 = smov 128   ;;  %308 = sbr.rel (%p1182_p12) target bundleno = 848 (0x350), region = 48 }
  0x43   : > { %825 = dma.hbm_to_vmem [thread:$0]  (!%p1198_p2), %s289_s21, 512, %s291_s24, %s281_s23, %s1075_s0, %s1396_s8, %s1395_s13  }
  0x44   : > { %p1397_p10 = scmp.eq.s32.totalorder (!%p1182_p12), %s1151_s30, 0 }
  0x47   : > { %1031 = dma.done.wait (%p1397_p10), [#allocation4], 256   ;;  %p1398_p6 = pmov %p1397_p10 }
  0x49   : > { %1033 = vsyncadd (%p1398_p6), [#allocation4], 4294967040  ;;  %p1399_p11 = pmov %p1398_p6 }
  0x4a   : > { %p1400_p4 = pmov %p1398_p6 }
  0x4b   : > { %1035 = dma.done.wait (%p1399_p11), [#allocation7], 512  }
  0x4c   : > { %1037 = vsyncadd (%p1400_p4), [#allocation7], 4294966784  ;;  %s318_s1 = sand.u32 1, %s1151_s30   ;;  %s1260_s24 = sand.u32 1, %s1052_s25  }
  0x4d   : > { %s754_s29 = sshll.u32 %s1260_s24, 5  ;;  %s319_s14 = scalar_lea.sflag [#allocation4], %s318_s1 }
  0x4e   : > { %s1263_s20 = scalar_lea.vmem [#allocation8], %s754_s29 }
  0x4f   : > { %1039 = dma.done.wait (%p1168_p7), %s319_s14, 512  }
  0x50   : > { %1041 = vsyncadd (%p1168_p7), %s319_s14, 4294966784  ;;  %s755_s23 = sshll.u32 %s1260_s24, 4  ;;  %p357_p12 = scmp.lt.s32.totalorder %s1060_s27, 1 }
  0x51   : > { %s1278_s21 = scalar_lea.vmem [#allocation9], %s755_s23  ;;  %p756_p2 = scmp.ne.s32.totalorder %s1060_s27, 0 }
  0x52   : > { %s1272_s17 = scalar_select %p357_p12, %s1060_s27, 1 }
  0x53   : > { %364 = sbr.rel (%p756_p2) target bundleno = 627 (0x273), region = 64 }
  0x54   : > { %s359_s18 = scalar_lea.vmem %s1370_s6, %s1272_s17 }
  0x58   : > { %v370_v0 = vld [vmem:[#allocation6 + $0x18] sm:$0xff]  ;;  %v369_v1 = vld [vmem:[#allocation6 + $0x10] sm:$0xff]  ;;  %vm378_vm0 = vcmask 261120   ;;  %v368_v3 = vld [vmem:[#allocation6 + $0x8] sm:$0xff] }
  0x59   : > { %781 = vmatprep.subr.mxu0 %v370_v0  ;;  %v365_v2 = vld [vmem:[#allocation3] sm:$0xff]  ;;  %v367_v4 = vld [vmem:[#allocation6] sm:$0xff]  ;;  %v366_v5 = vld [vmem:[#allocation3 + $0x8] sm:$0xff] }
  0x5a   : > { %782 = vmatpush3.msra.mxu0 %v370_v0  ;;  %789 = vmatprep.mubr.msk.f32.mxu0 %vm378_vm0, %v365_v2  ;;  %v757_v6 = vld [vmem:[%s1366_s2] ss:$0 sm:$0xff] }
  0x5b   : > { %783 = vmatprep.subr.mxu0 %v369_v1  ;;  %v760_v40 = vld [vmem:[%s1367_s3] ss:$0 sm:$0xff] }
  0x5c   : > { %784 = vmatpush3.msra.mxu0 %v369_v1  ;;  %v761_v42 = vld [vmem:[%s1368_s4] ss:$0 sm:$0xff] }
  0x5d   : > { %785 = vmatprep.subr.mxu0 %v368_v3 }
  0x5e   : > { %786 = vmatpush3.msra.mxu0 %v368_v3 }
  0x5f   : > { %787 = vmatprep.subr.mxu0 %v367_v4 }
  0x60   : > { %788 = vmatpush3.msra.mxu0 %v367_v4 }
  0x61   : > { %790 = vmatmul.mubr.msk.f32.vlgmr.msra.gmra.mxu0 %vm378_vm0, %v366_v5 }
 0x121   : > { %v791_v7 = vpop.f32.mrf.mxu0 }
 0x122   : > { %v457_v8 = vadd.f32 %v791_v7, %v757_v6 }
 0x123   : > { %v451_v9 = vpop.f32.mrf.mxu0 }
 0x124   : > { %v463_v10 = vmul.f32 0.70710677, %v457_v8  ;;  %v452_v11 = vadd.f32 %v757_v6, %v451_v9  ;;  %v461_v18 = vmul.f32 0.5, %v457_v8 }
 0x126   : > { %892 = verf.f32 %v463_v10  ;;  %v462_v12 = vmul.f32 0.70710677, %v452_v11  ;;  %v460_v15 = vmul.f32 0.5, %v452_v11 }
 0x128   : > { %894 = verf.f32 %v462_v12 }
 0x133   : > { %v893_v13 = vpop.eup %892 }
 0x134   : > { %v467_v17 = vadd.f32 1.0, %v893_v13 }
 0x135   : > { %v895_v14 = vpop.eup %894 }
 0x136   : > { %v466_v16 = vadd.f32 1.0, %v895_v14  ;;  %v469_v21 = vmul.f32 %v467_v17, %v461_v18 }
 0x138   : > { %v468_v19 = vmul.f32 %v466_v16, %v460_v15  ;;  %v473_v22 = vsel %vm378_vm0, %v469_v21, 0.0 }
 0x13a   : > { %v470_v20 = vsel %vm378_vm0, %v468_v19, 0.0 }
 0x13b   : > { %471 = vadd.xlane.f32.xlu0 %v470_v20 }
 0x13f   : > { %474 = vadd.xlane.f32.xlu0 %v473_v22 }
 0x1c4   : > { %v472_v23 = vpop.xlane.xlu0 %471 }
 0x1c5   : > { %v477_v24 = vmul.f32 0.03125, %v472_v23 }
 0x1c7   : > { %v479_v25 = vsub.f32 %v468_v19, %v477_v24 }
 0x1c8   : > { %v475_v26 = vpop.xlane.xlu0 %474 }
 0x1c9   : > { %v478_v27 = vmul.f32 0.03125, %v475_v26  ;;  %v481_v28 = vmul.f32 %v479_v25, %v479_v25 }
 0x1cb   : > { %v480_v29 = vsub.f32 %v469_v21, %v478_v27  ;;  %v483_v30 = vsel %vm378_vm0, %v481_v28, 0.0 }
 0x1cc   : > { %484 = vadd.xlane.f32.xlu1 %v483_v30 }
 0x1cd   : > { %v482_v31 = vmul.f32 %v480_v29, %v480_v29 }
 0x1cf   : > { %v486_v32 = vsel %vm378_vm0, %v482_v31, 0.0 }
 0x1d0   : > { %487 = vadd.xlane.f32.xlu1 %v486_v32 }
 0x255   : > { %v485_v33 = vpop.xlane.xlu1 %484 }
 0x256   : > { %v489_v34 = vmul.f32 0.03125, %v485_v33 }
 0x258   : > { %v491_v35 = vadd.f32 1e-05, %v489_v34 }
 0x259   : > { %v488_v36 = vpop.xlane.xlu1 %487 }
 0x25a   : > { %896 = vrsqrt.f32 %v491_v35  ;;  %v490_v37 = vmul.f32 0.03125, %v488_v36 }
 0x25c   : > { %v492_v38 = vadd.f32 1e-05, %v490_v37 }
 0x25e   : > { %898 = vrsqrt.f32 %v492_v38 }
 0x267   : > { %v897_v39 = vpop.eup %896 }
 0x268   : > { %v495_v41 = vmul.f32 %v897_v39, %v479_v25 }
 0x26a   : > { %v504_v43 = vmul.f32 %v760_v40, %v495_v41 }
 0x26b   : > { %v899_v44 = vpop.eup %898 }
 0x26c   : > { %v513_v45 = vadd.f32 %v761_v42, %v504_v43  ;;  %v496_v46 = vmul.f32 %v899_v44, %v480_v29 }
 0x26e   : > { %515 = vst.msk [vmem:[#allocation2] sm:$0xff] %vm378_vm0, %v513_v45  ;;  %v505_v47 = vmul.f32 %v760_v40, %v496_v46 }
 0x270   : > { %v514_v48 = vadd.f32 %v761_v42, %v505_v47 }
 0x272   : > { %516 = vst.msk [vmem:[#allocation2 + $0x8] sm:$0xff] %vm378_vm0, %v514_v48 }
 0x273 PF: > { %v522_v49 = vld [vmem:[%s1263_s20 + $0x18] sm:$0xff]  ;;  %v521_v50 = vld [vmem:[%s1263_s20 + $0x10] sm:$0xff]  ;;  %vm530_vm1 = vcmask 261120   ;;  %v520_v52 = vld [vmem:[%s1263_s20 + $0x8] sm:$0xff]  ;;  %s766_s29 = sshll.u32 %s1060_s27, 7  ;;  %s630_s14 = sshll.u32 %s1278_s21, 4  ;;  %s1314_s14 = int_to_ptr.vmem [resolvable:$true] %s630_s14 }
 0x274   : > { %792 = vmatprep.subr.mxu0 %v522_v49  ;;  %v519_v53 = vld [vmem:[%s1263_s20] sm:$0xff]  ;;  %s1312_s30 = scalar_lea.hbm %s1371_s7, %s766_s29  ;;  %s615_s17 = scalar_lea.sflag [#allocation5], %s1260_s24 }
 0x275   : > { %v517_v51 = vld [vmem:[#allocation2] sm:$0xff]  ;;  %793 = vmatpush3.msra.mxu0 %v522_v49  ;;  %s980_s15 = scalar_lea.vmem %s1314_s14, 256  ;;  %p1401_p13 = scmp.ne.s32.totalorder %s1386_s12, 0 }
 0x276   : > { %800 = vmatprep.mubr.msk.f32.mxu0 %vm530_vm1, %v517_v51  ;;  %794 = vmatprep.subr.mxu0 %v521_v50  ;;  %v762_v55 = vld [vmem:[%s359_s18] ss:$0 sm:$0xff]  ;;  %p981_p7 = scmp.ne.s32.totalorder %s1314_s14, %s980_s15  ;;  %s1076_s27 = smov [#allocation9]  }
 0x277   : > { %795 = vmatpush3.msra.mxu0 %v521_v50  ;;  %s984_s18 = sshll.u32 %s1076_s27, 4  ;;  %s985_s18 = int_to_ptr.vmem [resolvable:$false] %s984_s18 }
 0x278   : > { %796 = vmatprep.subr.mxu0 %v520_v52  ;;  %p982_p5 = pnand %p981_p7, %p1401_p13  ;;  %s986_s11 = scalar_lea.vmem %s985_s18, 512 }
 0x279   : > { %797 = vmatpush3.msra.mxu0 %v520_v52  ;;  %v518_v54 = vld [vmem:[#allocation2 + $0x8] sm:$0xff]  ;;  %p987_p3 = scmp.lt.s32.totalorder %s1314_s14, %s985_s18  ;;  %p988_p9 = scmp.lt.s32.totalorder %s986_s11, %s980_s15 }
 0x27a   : > { %798 = vmatprep.subr.mxu0 %v519_v53  ;;  %p983_p1 = pneg %p982_p5 }
 0x27b   : > { %799 = vmatpush3.msra.mxu0 %v519_v53  ;;  %p989_p8 = por %p988_p9, %p987_p3 }
 0x27c   : > { %801 = vmatmul.mubr.msk.f32.vlgmr.msra.gmra.mxu0 %vm530_vm1, %v518_v54 }
 0x27d   : > { %p990_p0 = pnand %p989_p8, %p983_p1 }
 0x33c   : > { %v802_v56 = vpop.f32.mrf.mxu0 }
 0x33d   : > { %v609_v57 = vadd.f32 %v802_v56, %v762_v55 }
 0x33e   : > { %v603_v58 = vpop.f32.mrf.mxu0 }
 0x33f   : > { %613 = vst [vmem:[%s1278_s21 + $0x8] sm:$0xff] %v609_v57  ;;  %v604_v59 = vadd.f32 %v762_v55, %v603_v58 }
 0x341   : > { %612 = vst [vmem:[%s1278_s21] sm:$0xff] %v604_v59 }
 0x342   : > { %993 = shalt.err (!%p990_p0)
}
 0x343   : > { %s994_s21 = scalar_lea.hbm %s1312_s30, 256  ;;  %s998_s9 = scalar_lea.hbm %s1371_s7, 512 }
 0x344   : > { %p995_p10 = scmp.ne.s32.totalorder %s1312_s30, %s994_s21  ;;  %p999_p4 = scmp.lt.s32.totalorder %s1312_s30, %s1371_s7 }
 0x345   : > { %p1000_p12 = scmp.lt.s32.totalorder %s998_s9, %s994_s21 }
 0x346   : > { %p996_p6 = pnand %p995_p10, %p1401_p13 }
 0x347   : > { %p1001_p2 = por %p1000_p12, %p999_p4 }
 0x348   : > { %p997_p11 = pneg %p996_p6 }
 0x34a   : > { %p1002_p7 = pnand %p1001_p2, %p997_p11 }
 0x34c   : > { %1005 = shalt.err (!%p1002_p7)
}
 0x34d   : > { %s1077_s8 = smov 128   ;;  %s1078_s1 = smov 256  }
 0x34e   : > { %s1079_s29 = smov 8  }
 0x34f   : > { %813 = dma.vmem_to_hbm [thread:$0]  (%p1401_p13), %s1314_s14, 256, %s1312_s30, %s615_s17, %s1077_s8, %s1078_s1, %s1079_s29  }
 0x350 PF: > { %s1402_s23 = sld [smem:[#allocation14_spill]] }
 0x351   : > { %s1403_s20 = sld [smem:[#allocation16_spill]] }
 0x352   : > { %s1404_s15 = sld [smem:[#allocation15_spill]] }
 0x356   : > { %s645_s27 = sand.u32 1, %s1402_s23  }
 0x357   : > { %p1405_p5 = scmp.ne.s32.totalorder %s1403_s20, 0  ;;  %s646_s18 = scalar_lea.sflag [#allocation5], %s645_s27 }
 0x358   : > { %p1406_p1 = scmp.ge.s32.totalorder %s1404_s15, 2 }
 0x35a   : > { %p827_p3 = pnand %p1406_p1, %p1405_p5 }
 0x35c   : > { %p828_p9 = pneg %p827_p3 }
 0x35e   : > { %1043 = dma.done.wait (%p828_p9), %s646_s18, 256  }
 0x35f   : > { %1045 = vsyncadd (%p828_p9), %s646_s18, 4294967040  ;;  %s22_s29 = sadd.s32 1, %s1404_s15   ;;  %s1407_s24 = smov %s1052_s25 }
 0x360   : > { %p19_p8 = scmp.ge.s32.totalorder %s22_s29, 4   ;;  %s1408_s25 = smov %s1056_s26 }
 0x361   : > { %s1409_s26 = smov %s1240_s22  ;;  %s1410_s27 = smov %s1064_s28 }
 0x362   : > { %s1411_s28 = smov %s1413_s16  ;;  %21 = sbr.rel (!%p19_p8) target bundleno = 9 (0x9), region = 108 }
 0x367   :  { %651 = vsyncpa [#allocation4], 1 }
 0x368   :  { %653 = vsyncpa [#allocation4 + $0x1], 1 }
 0x369   :  { %654 = vsyncpa [#allocation7], 1 }
 0x36a   :  { %655 = vsyncpa [#allocation5], 1 }
 0x36b   :  { %657 = vsyncpa [#allocation5 + $0x1], 1 }

</bundles_post_ra>
